<compile_context>
chip_gen: v7x
topology: tpu7x:2x2x1
jax: 0.10.0
libtpu: 0.0.40
codegen_flags: <defaults>
</compile_context>

<pallas_src>
from functools import partial

import jax
import jax.numpy as jnp
import numpy as np
from jax.experimental import pallas as pl
from jax.experimental.pallas import tpu as pltpu


# --------------------------------------------------------------------------- #
# Kernel
# --------------------------------------------------------------------------- #
def _add_pe_kernel(x_ref, pe_ref, o_ref, *, batch: int):
    # x_ref : (tS, B*E) lane-dense input tile
    # pe_ref: (tS, E)   positional-encoding rows for this tile
    # o_ref : (tS, B*E) output tile
    pe = pe_ref[...]                                     # (tS, E)
    if batch > 1:
        # Replicate pe along the fused batch*embedding lane axis:
        # result[s, b*E + e] = pe[s, e].  Lane concat is XLU/VPU work that hides
        # completely under the HBM DMAs (kernel is memory-bound).
        pe = jnp.concatenate([pe] * batch, axis=-1)      # (tS, B*E)
    o_ref[...] = x_ref[...] + pe


# --------------------------------------------------------------------------- #
# Parameter setup (plain JAX, mirrors the PyTorch __init__)
# --------------------------------------------------------------------------- #
def build_pe_table(embedding_dim: int, max_length: int = 512) -> jnp.ndarray:
    position = jnp.arange(0, max_length, dtype=jnp.float32)[:, None]           # (L, 1)
    div_term = jnp.exp(
        jnp.arange(0, embedding_dim, 2, dtype=jnp.float32)
        * (-jnp.log(jnp.float32(10000.0)) / embedding_dim)
    )                                                                           # (ceil(E/2),)
    pe = jnp.zeros((max_length, embedding_dim), dtype=jnp.float32)
    pe = pe.at[:, 0::2].set(jnp.sin(position * div_term))
    # Guard for odd embedding_dim (the PyTorch snippet would crash there; identical for even E).
    pe = pe.at[:, 1::2].set(jnp.cos(position * div_term[: embedding_dim // 2]))
    return pe                                                                   # (L, E)


# --------------------------------------------------------------------------- #
# Wrapper
# --------------------------------------------------------------------------- #
def _choose_block_rows(S: int, row_bytes: int,
                       target_bytes: int = 2 * 1024 * 1024,
                       max_rows: int = 1024) -> int:
    """Pick a sequence-tile height: multiple of 8 rows, ~target_bytes per x tile."""
    if S * row_bytes <= target_bytes:
        return S                                  # whole array as one block is fine
    t = min(max_rows, max(8, target_bytes // row_bytes))
    t = max(8, (t // 8) * 8)
    return min(t, S)


def fixed_positional_encoding(x: jnp.ndarray,
                              pe_table: jnp.ndarray,
                              *,
                              block_rows: int | None = None,
                              min_pallas_bytes: int = 16 * 1024) -> jnp.ndarray:
    """x: (S, B, E); pe_table: (max_length, E). Returns x + pe[:S] broadcast over batch."""
    S, B, E = x.shape
    L = pe_table.shape[0]
    if S > L:
        raise ValueError(f"sequence length {S} exceeds positional table length {L}")

    pe = pe_table[:S].astype(x.dtype)             # (S, E) — tiny; cast once outside

    itemsize = jnp.dtype(x.dtype).itemsize
    if S * B * E * itemsize < min_pallas_bytes:
        # Tiny problem: a fused XLA elementwise add beats any kernel launch.
        return x + pe[:, None, :]

    # Lane-dense 2-D view: last dim = B*E (full array dim -> always a valid block shape,
    # and for B*E a multiple of 128 the stores are fully unmasked).
    x2 = x.reshape(S, B * E)
    row_bytes = B * E * itemsize
    if block_rows is not None:
        tS = block_rows if block_rows >= S else max(8, (block_rows // 8) * 8)
        tS = min(tS, S)
    else:
        tS = _choose_block_rows(S, row_bytes)
    grid = (pl.cdiv(S, tS),)

    out2 = pl.pallas_call(
        partial(_add_pe_kernel, batch=B),
        out_shape=jax.ShapeDtypeStruct((S, B * E), x.dtype),
        grid_spec=pltpu.PrefetchScalarGridSpec(
            num_scalar_prefetch=0,
            grid=grid,
            in_specs=[
                pl.BlockSpec((tS, B * E), lambda i: (i, 0)),    # x tile (lane-dense)
                pl.BlockSpec((tS, E), lambda i: (i, 0)),        # pe rows for this tile
            ],
            out_specs=pl.BlockSpec((tS, B * E), lambda i: (i, 0)),
        ),
        compiler_params=pltpu.CompilerParams(
            dimension_semantics=("parallel",),                  # megacore-shardable on v7x
        ),
        cost_estimate=pl.CostEstimate(
            flops=S * B * E,
            transcendentals=0,
            bytes_accessed=2 * S * B * E * itemsize + S * E * itemsize,
        ),
    )(x2, pe)
    return out2.reshape(S, B, E)


# --------------------------------------------------------------------------- #
# Test
# --------------------------------------------------------------------------- #
if __name__ == "__main__":
    max_length = 512
    key = jax.random.PRNGKey(0)
    k1, k2, k3, k4 = jax.random.split(key, 4)

    # --- Case 1: Pallas path, multi-step grid, lane-dense (B*E = 128 lanes) ---
    S, B, E = 256, 2, 64
    pe_table = build_pe_table(E, max_length)
    x = jax.random.normal(k1, (S, B, E), dtype=jnp.float32)
    out = fixed_positional_encoding(x, pe_table, block_rows=64)   # grid = (4,)
    out = jax.block_until_ready(out)
    ref = x + pe_table[:S].astype(x.dtype)[:, None, :]
    np.testing.assert_allclose(np.asarray(out), np.asarray(ref), rtol=1e-6, atol=1e-6)

    # --- Case 2: ragged sequence length (S not a multiple of the block) -> masked tail ---
    S2, B2, E2 = 200, 2, 64
    x2 = jax.random.normal(k2, (S2, B2, E2), dtype=jnp.float32)
    out2 = fixed_positional_encoding(x2, pe_table, block_rows=64)  # grid = (4,), last tile partial
    out2 = jax.block_until_ready(out2)
    ref2 = x2 + pe_table[:S2].astype(x2.dtype)[:, None, :]
    np.testing.assert_allclose(np.asarray(out2), np.asarray(ref2), rtol=1e-6, atol=1e-6)

    # --- Case 3: bf16 input, auto block selection (single block), B=4 replication ---
    S3, B3, E3 = 160, 4, 32
    pe_table3 = build_pe_table(E3, max_length)
    x3 = jax.random.normal(k3, (S3, B3, E3), dtype=jnp.bfloat16)
    out3 = fixed_positional_encoding(x3, pe_table3)
    out3 = jax.block_until_ready(out3)
    ref3 = x3 + pe_table3[:S3].astype(jnp.bfloat16)[:, None, :]
    np.testing.assert_allclose(np.asarray(out3.astype(jnp.float32)),
                               np.asarray(ref3.astype(jnp.float32)),
                               rtol=1e-2, atol=1e-2)

    # --- Case 4: tiny original demo shape -> XLA-fallback path (below threshold) ---
    S4, B4, E4 = 8, 2, 32
    pe_table4 = build_pe_table(E4, max_length)
    x4 = jax.random.normal(k4, (S4, B4, E4), dtype=jnp.float32)
    out4 = fixed_positional_encoding(x4, pe_table4)
    out4 = jax.block_until_ready(out4)
    ref4 = x4 + pe_table4[:S4][:, None, :]
    np.testing.assert_allclose(np.asarray(out4), np.asarray(ref4), rtol=1e-6, atol=1e-6)

    print("KERNEL_OK")
</pallas_src>

<mosaic_0001>
module attributes {stable_mosaic.version = 11 : i64} {
  func.func @_add_pe_kernel(%arg0: i32, %arg1: memref<64x128xf32, #tpu.memory_space<vmem>>, %arg2: memref<64x64xf32, #tpu.memory_space<vmem>>, %arg3: memref<64x128xf32, #tpu.memory_space<vmem>>) attributes {dimension_semantics = [#tpu.dimension_semantics<parallel>], iteration_bounds = array<i64: 4>, scalar_prefetch = 0 : i64, scratch_operands = 0 : i64, tpu.core_type = #tpu.core_type<tc>, window_params = [{transform_indices = @transform_0, window_bounds = array<i64: 64, 128>}, {transform_indices = @transform_1, window_bounds = array<i64: 64, 64>}, {transform_indices = @transform_2, window_bounds = array<i64: 64, 128>}]} {
    %c0 = arith.constant 0 : index
    %c0_0 = arith.constant 0 : index
    %0 = vector.load %arg2[%c0, %c0_0] : memref<64x64xf32, #tpu.memory_space<vmem>>, vector<64x64xf32>
    %1 = tpu.concatenate %0, %0 in 1 : vector<64x64xf32>, vector<64x64xf32> -> vector<64x128xf32>
    %c0_1 = arith.constant 0 : index
    %c0_2 = arith.constant 0 : index
    %2 = vector.load %arg1[%c0_1, %c0_2] : memref<64x128xf32, #tpu.memory_space<vmem>>, vector<64x128xf32>
    %3 = arith.addf %2, %1 : vector<64x128xf32>
    %c0_3 = arith.constant 0 : index
    %c0_4 = arith.constant 0 : index
    %4 = vector.load %arg3[%c0_3, %c0_4] : memref<64x128xf32, #tpu.memory_space<vmem>>, vector<64x128xf32>
    tpu.vector_store %arg3[%c0_3, %c0_4], %3 {strides = array<i32>} : memref<64x128xf32, #tpu.memory_space<vmem>>, vector<64x128xf32>,
    return
  }
  func.func @transform_0(%arg0: i32) -> (i32, i32) {
    %c0_i32 = arith.constant 0 : i32
    %c0_i32_0 = arith.constant 0 : i32
    return %arg0, %c0_i32 : i32, i32
  }
  func.func @transform_1(%arg0: i32) -> (i32, i32) {
    %c0_i32 = arith.constant 0 : i32
    %c0_i32_0 = arith.constant 0 : i32
    return %arg0, %c0_i32 : i32, i32
  }
  func.func @transform_2(%arg0: i32) -> (i32, i32) {
    %c0_i32 = arith.constant 0 : i32
    %c0_i32_0 = arith.constant 0 : i32
    return %arg0, %c0_i32 : i32, i32
  }
}

</mosaic_0001>

<bundles_post_ra>
// kernel: tpu_custom_call.1
= control target key start
LH: loop header
LB: loop body
LE: loop exit
PB: predicated region body
PF: predicated region fallthrough
CT: control target
= control target key end

     0   :  { %7 = vsyncpa [#allocation3], 0  ;;  %s606_s0 = inlined_call_operand.vmem [shape: f32[256,128], index: 0, kind: input, shape index: {}]   ;;  %s607_s1 = inlined_call_operand.vmem [shape: f32[256,64], index: 1, kind: input, shape index: {}]   ;;  %s608_s2 = inlined_call_operand.hbm [shape: f32[256,128], index: 2, kind: output, shape index: {}]  }
   0x1   :  { %9 = vsyncpa [#allocation3 + $0x1], 0  ;;  %s468_s9 = smov 0   ;;  %s470_s10 = smov 0  }
   0x2   :  { %s472_s11 = smov 0   ;;  %s474_s12 = smov 0  }
   0x3 LB: > { %s489_s13 = sadd.s32 4294967295, %s447_s12   ;;  %s328_s14 = sadd.s32 4294967294, %s447_s12   ;;  %s447_s12 = sphi %s474_s12, %s614_s12   ;;  %s443_s11 = sphi %s472_s11, %s613_s11   ;;  %s439_s10 = sphi %s470_s10, %s612_s10   ;;  %s435_s9 = sphi %s468_s9, %s611_s9  }
   0x4   : > { %s493_s15 = sadd.s32 1, %s447_s12   ;;  %s74_s16 = sadd.s32 1, %s443_s11 }
   0x5   : > { %s71_s17 = ssub.s32 %s447_s12, %s493_s15  ;;  %p84_p0 = scmp.ne.s32.totalorder %s443_s11, %s439_s10 }
   0x6   : > { %p72_p1 = scmp.eq.s32.totalorder %s71_s17, 0  ;;  %p85_p2 = scmp.eq.s32.totalorder %s489_s13, 3 }
   0x7   : > { %p90_p3 = scmp.ne.s32.totalorder %s439_s10, %s435_s9  ;;  %p91_p4 = scmp.eq.s32.totalorder %s328_s14, 3 }
   0x8   : > { %s504_s18 = scalar_select %p72_p1, %s443_s11, %s74_s16  }
   0x9   : > { %p506_p5 = por %p85_p2, %p84_p0  ;;  %p510_p6 = por %p91_p4, %p90_p3 }
   0xa   : > { %p331_p7 = scmp.ge.s32.totalorder %s447_s12, 1  ;;  %p127_p8 = scmp.lt.s32.totalorder %s447_s12, 5 }
   0xc   : > { %p128_p9 = pnand %p331_p7, %p127_p8 }
   0xd   : > { %s333_s21 = sshll.u32 (!%p128_p9), %s489_s13, 3  ;;  %s449_s26 = smov (!%p128_p9), 64   ;;  %vm207_vm0 = vcmask (!%p128_p9), 523264  }
   0xe   : > { %131 = sbr.rel (%p128_p9) target bundleno = 170 (0xaa), region = 28  ;;  %p155_p10 = scmp.lt.s32.totalorder (!%p128_p9), %s333_s21, 31 }
   0xf   : > { %s151_s27 = sand.u32 (!%p128_p9), 1, %s439_s10   ;;  %s342_s5 = sshll.u32 (!%p128_p9), %s489_s13, 10 }
  0x10   : > { %s332_s3 = sshll.u32 (!%p128_p9), %s151_s27, 6  ;;  %s557_s14 = scalar_lea.hbm (!%p128_p9), %s608_s2, %s342_s5 }
  0x11   : > { %s534_s4 = scalar_lea.vmem (!%p128_p9), [#allocation2], %s332_s3  ;;  %s565_s13 = scalar_lea.sflag (!%p128_p9), [#allocation3], %s151_s27 }
  0x12   : > { %s254_s6 = sshll.u32 (!%p128_p9), %s534_s4, 4  ;;  %s450_s17 = smov (!%p128_p9), [#allocation2]   ;;  %s559_s6 = int_to_ptr.vmem [resolvable:$true] %s254_s6 }
  0x13   : > { %s385_s16 = scalar_lea.vmem (!%p128_p9), %s559_s6, 1024 }
  0x14   : > { %p386_p11 = scmp.ne.s32.totalorder (!%p128_p9), %s559_s6, %s385_s16 }
  0x15   : > { %s616_s21 = smov (!%p155_p10, %s333_s21), 31 }
  0x16   : > { %s334_s22 = sshll.u32 %s616_s21, 3  ;;  %p387_p12 = pnand %p386_p11, %p506_p5 }
  0x17   : > { %s164_s25 = scalar_lea.vmem %s607_s1, %s334_s22  ;;  %s524_s30 = scalar_lea.vmem %s606_s0, %s334_s22 }
  0x18   : > { %v169_v0 = vld [vmem:[%s164_s25 + $0x10] sm:$0xff]  ;;  %v167_v1 = vld [vmem:[%s164_s25] sm:$0xff]  ;;  %v170_v2 = vld [vmem:[%s164_s25 + $0x18] sm:$0xff]  ;;  %p388_p13 = pneg %p387_p12  ;;  %s389_s21 = sshll.u32 %s450_s17, 4  ;;  %s390_s21 = int_to_ptr.vmem [resolvable:$false] %s389_s21 }
  0x19   : > { %187 = vrot.lane.b32.xlu1 %v169_v0, %s449_s26  ;;  %183 = vrot.lane.b32.xlu0 %v167_v1, %s449_s26  ;;  %v168_v3 = vld [vmem:[%s164_s25 + $0x8] sm:$0xff]  ;;  %v171_v5 = vld [vmem:[%s164_s25 + $0x20] sm:$0xff]  ;;  %s391_s22 = scalar_lea.vmem %s390_s21, 2048  ;;  %p392_p0 = scmp.lt.s32.totalorder %s559_s6, %s390_s21 }
  0x1a   : > { %v172_v4 = vld [vmem:[%s164_s25 + $0x28] sm:$0xff]  ;;  %v174_v6 = vld [vmem:[%s164_s25 + $0x38] sm:$0xff]  ;;  %v173_v7 = vld [vmem:[%s164_s25 + $0x30] sm:$0xff]  ;;  %p393_p1 = scmp.lt.s32.totalorder %s391_s22, %s385_s16 }
  0x1b   : > { %v218_v8 = vld [vmem:[%s524_s30 + $0x10] sm:$0xff]  ;;  %v216_v9 = vld [vmem:[%s524_s30] sm:$0xff]  ;;  %v219_v16 = vld [vmem:[%s524_s30 + $0x18] sm:$0xff] }
  0x1c   : > { %v217_v17 = vld [vmem:[%s524_s30 + $0x8] sm:$0xff]  ;;  %v220_v25 = vld [vmem:[%s524_s30 + $0x20] sm:$0xff]  ;;  %v223_v32 = vld [vmem:[%s524_s30 + $0x38] sm:$0xff]  ;;  %p394_p2 = por %p393_p1, %p392_p0 }
  0x1d   : > { %189 = vrot.lane.b32.xlu1 %v170_v2, %s449_s26  ;;  %185 = vrot.lane.b32.xlu0 %v168_v3, %s449_s26  ;;  %v221_v24 = vld [vmem:[%s524_s30 + $0x28] sm:$0xff]  ;;  %v222_v33 = vld [vmem:[%s524_s30 + $0x30] sm:$0xff] }
  0x1e   : > { %p395_p3 = pnand %p394_p2, %p388_p13 }
  0x21   : > { %193 = vrot.lane.b32.xlu1 %v172_v4, %s449_s26  ;;  %191 = vrot.lane.b32.xlu0 %v171_v5, %s449_s26 }
  0x25   : > { %197 = vrot.lane.b32.xlu1 %v174_v6, %s449_s26  ;;  %195 = vrot.lane.b32.xlu0 %v173_v7, %s449_s26 }
  0x8b   : > { %v188_v10 = vpop.permute.xlu1 %187  ;;  %v184_v11 = vpop.permute.xlu0 %183 }
  0x8c   : > { %v210_v12 = vsel %vm207_vm0, %v169_v0, %v188_v10  ;;  %v208_v13 = vsel %vm207_vm0, %v167_v1, %v184_v11 }
  0x8d   : > { %v226_v14 = vadd.f32 %v218_v8, %v210_v12  ;;  %v224_v15 = vadd.f32 %v216_v9, %v208_v13 }
  0x8f   : > { %234 = vst [vmem:[%s534_s4 + $0x10] sm:$0xff] %v226_v14  ;;  %232 = vst [vmem:[%s534_s4] sm:$0xff] %v224_v15  ;;  %v190_v18 = vpop.permute.xlu1 %189  ;;  %v186_v19 = vpop.permute.xlu0 %185 }
  0x90   : > { %v211_v20 = vsel %vm207_vm0, %v170_v2, %v190_v18  ;;  %v209_v21 = vsel %vm207_vm0, %v168_v3, %v186_v19 }
  0x91   : > { %v227_v22 = vadd.f32 %v219_v16, %v211_v20  ;;  %v225_v23 = vadd.f32 %v217_v17, %v209_v21 }
  0x93   : > { %235 = vst [vmem:[%s534_s4 + $0x18] sm:$0xff] %v227_v22  ;;  %233 = vst [vmem:[%s534_s4 + $0x8] sm:$0xff] %v225_v23  ;;  %v194_v26 = vpop.permute.xlu1 %193  ;;  %v192_v27 = vpop.permute.xlu0 %191 }
  0x94   : > { %v213_v28 = vsel %vm207_vm0, %v172_v4, %v194_v26  ;;  %v212_v29 = vsel %vm207_vm0, %v171_v5, %v192_v27 }
  0x95   : > { %v229_v30 = vadd.f32 %v221_v24, %v213_v28  ;;  %v228_v31 = vadd.f32 %v220_v25, %v212_v29 }
  0x97   : > { %237 = vst [vmem:[%s534_s4 + $0x28] sm:$0xff] %v229_v30  ;;  %236 = vst [vmem:[%s534_s4 + $0x20] sm:$0xff] %v228_v31  ;;  %v198_v34 = vpop.permute.xlu1 %197  ;;  %v196_v35 = vpop.permute.xlu0 %195 }
  0x98   : > { %v215_v36 = vsel %vm207_vm0, %v174_v6, %v198_v34  ;;  %v214_v37 = vsel %vm207_vm0, %v173_v7, %v196_v35 }
  0x99   : > { %v231_v38 = vadd.f32 %v223_v32, %v215_v36  ;;  %v230_v39 = vadd.f32 %v222_v33, %v214_v37 }
  0x9b   : > { %239 = vst [vmem:[%s534_s4 + $0x38] sm:$0xff] %v231_v38  ;;  %238 = vst [vmem:[%s534_s4 + $0x30] sm:$0xff] %v230_v39 }
  0x9c   : > { %398 = shalt.err (!%p395_p3)
}
  0x9d   : > { %s399_s23 = scalar_lea.hbm %s557_s14, 1024  ;;  %s403_s26 = scalar_lea.hbm %s608_s2, 4096 }
  0x9e   : > { %p400_p4 = scmp.ne.s32.totalorder %s557_s14, %s399_s23  ;;  %p404_p9 = scmp.lt.u32.totalorder %s557_s14, %s608_s2 }
  0x9f   : > { %p405_p10 = scmp.lt.u32.totalorder %s403_s26, %s399_s23  ;;  %p407_p12 = scmp.lt.u32.totalorder %s399_s23, %s557_s14 }
  0xa0   : > { %p401_p7 = pnand %p400_p4, %p506_p5 }
  0xa1   : > { %p406_p11 = por %p405_p10, %p404_p9 }
  0xa2   : > { %p402_p8 = pneg %p401_p7 }
  0xa3   : > { %p408_p13 = por %p407_p12, %p406_p11 }
  0xa5   : > { %p409_p0 = pnand %p408_p13, %p402_p8 }
  0xa7   : > { %412 = shalt.err (!%p409_p0)
}
  0xa8   : > { %s451_s29 = smov 128   ;;  %s452_s30 = smov 8  }
  0xa9   : > { %343 = dma.vmem_to_hbm [thread:$0]  (%p506_p5), %s559_s6, 1024, %s557_s14, %s565_s13, %s451_s29, %s451_s29, %s452_s30  }
  0xaa PF: > { %p349_p1 = scmp.ge.s32.totalorder %s447_s12, 2  ;;  %s269_s3 = sand.u32 1, %s435_s9  }
  0xab   : > { %s270_s4 = scalar_lea.sflag [#allocation3], %s269_s3 }
  0xac   : > { %p346_p2 = pnand %p349_p1, %p510_p6 }
  0xae   : > { %430 = dma.done.wait (!%p346_p2), %s270_s4, 1024  }
  0xaf   : > { %432 = vsyncadd (!%p346_p2), %s270_s4, 4294966272  ;;  %p12_p3 = scmp.ge.s32.totalorder %s493_s15, 6   ;;  %s611_s9 = smov %s439_s10 }
  0xb0   : > { %s612_s10 = smov %s443_s11  ;;  %s613_s11 = smov %s504_s18 }
  0xb1   : > { %s614_s12 = smov %s493_s15  ;;  %14 = sbr.rel (!%p12_p3) target bundleno = 3 (0x3), region = 66 }
  0xb8   :  { %275 = vsyncpa [#allocation3], 1 }
  0xb9   :  { %277 = vsyncpa [#allocation3 + $0x1], 1 }

</bundles_post_ra>
